<compile_context>
chip_gen: v6e
topology: v6e:2x2x1
jax: 0.10.0
libtpu: 0.0.40
codegen_flags: <defaults>
</compile_context>

<pallas_src>
import functools

import jax
import jax.numpy as jnp
from jax.experimental import pallas as pl
from jax.experimental.pallas import tpu as pltpu

NUM_EVENTS = 29  # event_classifier: Linear(hidden, 29)


def _wlm_kernel(x_ref, w_cls_ref, b_cls_ref, w_evt_ref, b_evt_ref,
                is_event_ref, raw_ref, scores_ref,
                maxf_ref, smax_ref, smin_ref,
                *, total_t, ragged):
    """Grid = (batch tiles ["parallel"], time tiles ["arbitrary", innermost])."""
    ti = pl.program_id(1)
    bt, bb, _ = x_ref.shape

    @pl.when(ti == 0)
    def _init():
        maxf_ref[...] = jnp.full_like(maxf_ref, -jnp.inf)   # running max over T of x
        smax_ref[...] = jnp.full_like(smax_ref, -jnp.inf)   # running max over T of s
        smin_ref[...] = jnp.full_like(smin_ref, jnp.inf)    # running min over T of s

    x = x_ref[...].astype(jnp.float32)          # (bt, bb, D), lane = D
    w_cls = w_cls_ref[...]                      # (1, D)
    b_cls = b_cls_ref[0]                        # scalar (SMEM)

    # classifier Linear(D, 1): VPU multiply + cross-lane (XLU) reduce over D.
    # Cost ~ (7*128/D) XLU ops per streamed input vreg, which stays under the
    # 2 XLU slots/cycle the HBM stream can feed for D >= ~128.  If a bundle
    # dump ever shows the vex slot saturating, reformulate as an MXU dot of a
    # (bt*bb, D) view of the tile against w_cls reshaped (D, 1).
    s_tb = jnp.sum(x * w_cls[None, :, :], axis=-1) + b_cls   # (bt, bb), lane = batch
    is_event_ref[...] = s_tb.astype(is_event_ref.dtype)      # time-major output block

    if ragged:
        # Rows beyond the true T in the last (partial) time tile hold
        # unspecified padding; mask them out of every reduction.
        row = jax.lax.broadcasted_iota(jnp.int32, (bt, 1), 0)
        valid = row < (total_t - ti * bt)                     # (bt, 1)
        x_max_in = jnp.where(valid[:, :, None], x, -jnp.inf)
        s_max_in = jnp.where(valid, s_tb, -jnp.inf)
        s_min_in = jnp.where(valid, s_tb, jnp.inf)
    else:
        x_max_in, s_max_in, s_min_in = x, s_tb, s_tb

    # running reductions over the time axis (cheap VALU / small XLU work)
    maxf_ref[...] = jnp.maximum(maxf_ref[...], jnp.max(x_max_in, axis=0))       # (bb, D)
    smax_ref[0:1, 0:bb] = jnp.maximum(
        smax_ref[0:1, 0:bb], jnp.max(s_max_in, axis=0, keepdims=True))          # (1, bb)
    smin_ref[0:1, 0:bb] = jnp.minimum(
        smin_ref[0:1, 0:bb], jnp.min(s_min_in, axis=0, keepdims=True))          # (1, bb)

    # NOTE: raw_ref / scores_ref use index_maps that are constant in ti, so the
    # block stays resident in VMEM across the whole (innermost, "arbitrary")
    # time loop and is written back to HBM once, after this finalize fills it.
    # Do not reorder the grid (ti must stay innermost) or change those
    # index_maps without revisiting this.
    @pl.when(ti == pl.num_programs(1) - 1)
    def _finalize():
        # raw_logits = Linear(D, 29)(max_fused)  -> (bb, C)   (MXU matmul)
        raw = jnp.dot(maxf_ref[...], w_evt_ref[...],
                      preferred_element_type=jnp.float32) + b_evt_ref[...]

        # Move the per-batch score extrema from lane layout (row 0 of the
        # (8, bbl) scratch) to sublane layout (bb, 1) with one tile-aligned
        # XLU transpose (replaces the old O(bb^2) diagonal-mask trick).
        smax_col = smax_ref[...].T[0:bb, 0:1]                 # (bb, 1)
        smin_col = smin_ref[...].T[0:bb, 0:1]                 # (bb, 1)

        # max_t sigmoid(s_bt) * raw_bc
        #   == where(raw_bc >= 0, sigmoid(max_t s_bt), sigmoid(min_t s_bt)) * raw_bc
        # (raw is T-invariant, sigmoid is monotone).
        sig_hi = jax.nn.sigmoid(smax_col)
        sig_lo = jax.nn.sigmoid(smin_col)
        logits = jnp.where(raw >= 0.0, sig_hi * raw, sig_lo * raw)              # (bb, C)

        # softmax over the class axis
        m = jnp.max(logits, axis=-1, keepdims=True)
        e = jnp.exp(logits - m)
        probs = e / jnp.sum(e, axis=-1, keepdims=True)

        raw_ref[...] = raw.astype(raw_ref.dtype)
        scores_ref[...] = probs.astype(scores_ref.dtype)


def _vmem_limit_bytes():
    """Per-generation scoped-VMEM limit (v7x: 64 MiB physical, v5e/v6e: 128 MiB)."""
    try:
        cap = int(pltpu.get_tpu_info().vmem_capacity_bytes)
    except Exception:
        cap = 64 * 1024 * 1024          # conservative fallback = v7x physical VMEM
    return max(16 * 1024 * 1024, min(cap * 3 // 4, 100 * 1024 * 1024))


def _pick_batch_tile(B):
    """bb is the lane dim of the time-major (T, B) is_event output block, so it
    must be a multiple of 128 or equal to B.  When B allows it we split the
    batch so the "parallel" grid axis has >= 2 blocks (keeps both v7x
    TensorCores busy); for smaller B the lane rule forces bb == B."""
    if B >= 256 and B % 128 == 0:
        return 128
    return B


def _pick_time_tile(T, bb, D, in_itemsize, tile_budget_bytes):
    """bt is the sublane dim of the (T, B) is_event block -> multiple of 8 (or == T)."""
    bytes_per_row = max(1, bb * D * in_itemsize)
    rows = tile_budget_bytes // bytes_per_row
    if rows >= T:
        return T
    return max(8, (rows // 8) * 8)


def weakly_localization_module(fused_content, w_cls, b_cls, w_evt, b_evt,
                               *, batch_block=None, time_block=None):
    """fused_content: (T, B, D), seq-first, f32 or bf16 (bf16 halves the HBM
    stream this kernel is bound by; it is upcast to f32 inside the kernel).

    Parameters (stored as (in, out)):
      w_cls: (D,)    b_cls: ()     -- classifier        Linear(D, 1)
      w_evt: (D,29)  b_evt: (29,)  -- event_classifier  Linear(D, 29)
    Returns (is_event_scores (B,T), raw_logits (B,29), event_scores (B,29)).
    """
    T, B, D = fused_content.shape
    C = w_evt.shape[-1]
    in_itemsize = jnp.dtype(fused_content.dtype).itemsize

    w_cls2 = jnp.asarray(w_cls, jnp.float32).reshape(1, D)
    b_cls2 = jnp.asarray(b_cls, jnp.float32).reshape(1)
    w_evt2 = jnp.asarray(w_evt, jnp.float32).reshape(D, C)
    b_evt2 = jnp.asarray(b_evt, jnp.float32).reshape(1, C)

    vmem_limit = _vmem_limit_bytes()

    bb = _pick_batch_tile(B) if batch_block is None else int(batch_block)
    # Mosaic block rules: bb is the lane dim of the (T, B) is_event block and
    # the sublane dim of the input / (B, C) blocks.
    assert bb == B or (bb % 128 == 0 and B % bb == 0), (
        f"batch_block must equal B or be a multiple of 128 dividing B; got {bb} for B={B}")
    nb = B // bb

    bbl = max(128, -(-bb // 128) * 128)  # lane-padded width of the smax/smin scratch

    # Per-step input tile budget: this kernel is a pure HBM stream, so tiles
    # should be ~8-16 MiB (per-grid-step overhead ~0.35 us becomes negligible)
    # while 2x (double-buffered) input tiles + the (bb, D) accumulator +
    # resident weights stay inside the per-generation scoped VMEM limit.
    fixed = 4 * (bb * D                 # maxf accumulator
                 + 2 * 8 * bbl          # smax/smin accumulators
                 + D * C + C + D        # resident weights / biases
                 + 4 * bb * C)          # raw / scores blocks (double-buffered)
    slack = 4 << 20                     # is_event out blocks + Mosaic internal scratch
    tile_budget = max(2 << 20, min(16 << 20, (vmem_limit - fixed - slack) * 2 // 5))

    if time_block is None:
        bt = _pick_time_tile(T, bb, D, in_itemsize, tile_budget)
    else:
        bt = int(time_block)
    assert bt == T or (bt % 8 == 0 and 0 < bt <= T), (
        f"time_block must equal T or be a multiple of 8 <= T; got {bt} for T={T}")

    nt = pl.cdiv(T, bt)
    ragged = (T % bt) != 0
    t_pad = nt * bt   # is_event is produced as (t_pad, B) and sliced to T below

    out_shapes = (
        jax.ShapeDtypeStruct((t_pad, B), jnp.float32),   # is_event, time-major
        jax.ShapeDtypeStruct((B, C), jnp.float32),       # raw_logits
        jax.ShapeDtypeStruct((B, C), jnp.float32),       # event_scores
    )

    cost = pl.CostEstimate(
        flops=int(3 * B * T * D + 2 * B * D * C + 8 * B * C),
        transcendentals=int(2 * B + B * C),
        bytes_accessed=int(in_itemsize * T * B * D + 4 * (D + 1 + D * C + C)
                           + 4 * (T * B + 2 * B * C)),
    )

    kernel = functools.partial(_wlm_kernel, total_t=T, ragged=ragged)

    fn = pl.pallas_call(
        kernel,
        out_shape=out_shapes,
        grid=(nb, nt),   # batch (parallel) outer, time (reduction) innermost
        in_specs=[
            # (T, B, D) input: the (1,0,2) transpose is folded into the index_map.
            pl.BlockSpec((bt, bb, D), lambda bi, ti: (ti, bi, 0)),
            pl.BlockSpec((1, D), lambda bi, ti: (0, 0)),          # w_cls (resident)
            pl.BlockSpec(memory_space=pltpu.MemorySpace.SMEM),    # b_cls scalar
            pl.BlockSpec((D, C), lambda bi, ti: (0, 0)),          # w_evt (resident)
            pl.BlockSpec((1, C), lambda bi, ti: (0, 0)),          # b_evt (resident)
        ],
        out_specs=(
            pl.BlockSpec((bt, bb), lambda bi, ti: (ti, bi)),      # is_event (t_pad, B)
            # Constant-in-ti index_maps: blocks stay resident across the whole
            # time loop and are written back once after the finalize step.
            pl.BlockSpec((bb, C), lambda bi, ti: (bi, 0)),        # raw_logits
            pl.BlockSpec((bb, C), lambda bi, ti: (bi, 0)),        # event_scores
        ),
        scratch_shapes=[
            pltpu.VMEM((bb, D), jnp.float32),    # running max over T of x
            pltpu.VMEM((8, bbl), jnp.float32),   # running max over T of s (row 0, lane = batch)
            pltpu.VMEM((8, bbl), jnp.float32),   # running min over T of s (row 0, lane = batch)
        ],
        compiler_params=pltpu.CompilerParams(
            dimension_semantics=("parallel", "arbitrary"),
            vmem_limit_bytes=int(vmem_limit),
        ),
        cost_estimate=cost,
    )
    is_event_tb, raw, scores = fn(fused_content, w_cls2, b_cls2, w_evt2, b_evt2)
    # Tiny (t_pad, B) result -> cheap wrapper-side slice (ragged-T pad rows) and
    # transpose to the PyTorch (B, T) layout.
    return is_event_tb[:T].T, raw, scores


def _reference(fused_content, w_cls, b_cls, w_evt, b_evt):
    # Direct (un-rewritten) formulation to guard the max(sigmoid*raw) algebra.
    x = jnp.transpose(fused_content, (1, 0, 2)).astype(jnp.float32)   # (B, T, D)
    max_fused = jnp.max(x, axis=1)                                    # (B, D)
    is_event = jnp.einsum("btd,d->bt", x, w_cls) + b_cls              # (B, T)
    raw = max_fused @ w_evt + b_evt                                   # (B, C)
    fused = jax.nn.sigmoid(is_event)[:, :, None] * raw[:, None, :]    # (B, T, C)
    logits = jnp.max(fused, axis=1)                                   # (B, C)
    return is_event, raw, jax.nn.softmax(logits, axis=-1)


def _check(T, B, D, key, **block_overrides):
    k_x, k_wc, k_bc, k_we, k_be = jax.random.split(key, 5)
    fused_content = jax.random.normal(k_x, (T, B, D), dtype=jnp.float32)
    bound = 1.0 / (D ** 0.5)
    w_cls = jax.random.uniform(k_wc, (D,), jnp.float32, -bound, bound)
    b_cls = jax.random.uniform(k_bc, (), jnp.float32, -bound, bound)
    w_evt = jax.random.uniform(k_we, (D, NUM_EVENTS), jnp.float32, -bound, bound)
    b_evt = jax.random.uniform(k_be, (NUM_EVENTS,), jnp.float32, -bound, bound)

    outs = weakly_localization_module(fused_content, w_cls, b_cls, w_evt, b_evt,
                                      **block_overrides)
    outs = jax.block_until_ready(outs)
    refs = _reference(fused_content, w_cls, b_cls, w_evt, b_evt)
    for o, r in zip(outs, refs):
        assert o.shape == r.shape, (o.shape, r.shape)
        assert jnp.allclose(o, r, atol=1e-5, rtol=1e-5), float(jnp.max(jnp.abs(o - r)))


if __name__ == "__main__":
    key = jax.random.PRNGKey(0)
    k1, k2, k3 = jax.random.split(key, 3)
    # Small shape consistent with the module: seq T=8, batch B=2, hidden D=32.
    _check(8, 2, 32, k1)
    # Multi-step time reduction (4 T-tiles) exercising the accumulator path.
    _check(32, 4, 32, k2, time_block=8)
    # Ragged T (cdiv grid + masked partial final tile).
    _check(28, 4, 32, k3, time_block=8)
    print("KERNEL_OK")
</pallas_src>

<mosaic_0001>
module attributes {stable_mosaic.version = 11 : i64} {
  func.func @_wlm_kernel(%arg0: i32, %arg1: i32, %arg2: memref<8x2x32xf32, #tpu.memory_space<vmem>>, %arg3: memref<1x32xf32, #tpu.memory_space<vmem>>, %arg4: memref<1xf32, #tpu.memory_space<smem>>, %arg5: memref<32x29xf32, #tpu.memory_space<vmem>>, %arg6: memref<1x29xf32, #tpu.memory_space<vmem>>, %arg7: memref<8x2xf32, #tpu.memory_space<vmem>>, %arg8: memref<2x29xf32, #tpu.memory_space<vmem>>, %arg9: memref<2x29xf32, #tpu.memory_space<vmem>>, %arg10: memref<2x32xf32, #tpu.memory_space<vmem>>, %arg11: memref<8x128xf32, #tpu.memory_space<vmem>>, %arg12: memref<8x128xf32, #tpu.memory_space<vmem>>) attributes {dimension_semantics = [#tpu.dimension_semantics<parallel>, #tpu.dimension_semantics<arbitrary>], iteration_bounds = array<i64: 1, 1>, scalar_prefetch = 0 : i64, scratch_operands = 3 : i64, tpu.core_type = #tpu.core_type<tc>, window_params = [{transform_indices = @transform_0, window_bounds = array<i64: 8, 2, 32>}, {pipeline_mode = #tpu.pipeline_mode<synchronous>, transform_indices = @transform_1, window_bounds = array<i64: 1, 32>}, {transform_indices = @transform_2, window_bounds = array<i64: 1>}, {pipeline_mode = #tpu.pipeline_mode<synchronous>, transform_indices = @transform_3, window_bounds = array<i64: 32, 29>}, {pipeline_mode = #tpu.pipeline_mode<synchronous>, transform_indices = @transform_4, window_bounds = array<i64: 1, 29>}, {transform_indices = @transform_5, window_bounds = array<i64: 8, 2>}, {transform_indices = @transform_6, window_bounds = array<i64: 2, 29>}, {transform_indices = @transform_7, window_bounds = array<i64: 2, 29>}]} {
    %c0_i32 = arith.constant 0 : i32
    %0 = arith.cmpi eq, %arg1, %c0_i32 : i32
    %1 = arith.extui %0 : i1 to i32
    %c0_i32_0 = arith.constant 0 : i32
    %2 = arith.cmpi ne, %1, %c0_i32_0 : i32
    scf.if %2 {
      %cst_25 = arith.constant 0xFF800000 : f32
      %30 = vector.broadcast %cst_25 : f32 to vector<2x32xf32>
      %c0_26 = arith.constant 0 : index
      %c0_27 = arith.constant 0 : index
      %31 = vector.load %arg10[%c0_26, %c0_27] : memref<2x32xf32, #tpu.memory_space<vmem>>, vector<2x32xf32>
      tpu.vector_store %arg10[%c0_26, %c0_27], %30 {strides = array<i32>} : memref<2x32xf32, #tpu.memory_space<vmem>>, vector<2x32xf32>,
      %cst_28 = arith.constant 0xFF800000 : f32
      %32 = vector.broadcast %cst_28 : f32 to vector<8x128xf32>
      %c0_29 = arith.constant 0 : index
      %c0_30 = arith.constant 0 : index
      %33 = vector.load %arg11[%c0_29, %c0_30] : memref<8x128xf32, #tpu.memory_space<vmem>>, vector<8x128xf32>
      tpu.vector_store %arg11[%c0_29, %c0_30], %32 {strides = array<i32>} : memref<8x128xf32, #tpu.memory_space<vmem>>, vector<8x128xf32>,
      %cst_31 = arith.constant 0x7F800000 : f32
      %34 = vector.broadcast %cst_31 : f32 to vector<8x128xf32>
      %c0_32 = arith.constant 0 : index
      %c0_33 = arith.constant 0 : index
      %35 = vector.load %arg12[%c0_32, %c0_33] : memref<8x128xf32, #tpu.memory_space<vmem>>, vector<8x128xf32>
      tpu.vector_store %arg12[%c0_32, %c0_33], %34 {strides = array<i32>} : memref<8x128xf32, #tpu.memory_space<vmem>>, vector<8x128xf32>,
    } else {
    }
    %c0 = arith.constant 0 : index
    %c0_1 = arith.constant 0 : index
    %c0_2 = arith.constant 0 : index
    %3 = vector.load %arg2[%c0, %c0_1, %c0_2] : memref<8x2x32xf32, #tpu.memory_space<vmem>>, vector<8x2x32xf32>
    %c0_3 = arith.constant 0 : index
    %c0_4 = arith.constant 0 : index
    %4 = vector.load %arg3[%c0_3, %c0_4] : memref<1x32xf32, #tpu.memory_space<vmem>>, vector<1x32xf32>
    %c0_5 = arith.constant 0 : index
    %5 = memref.load %arg4[%c0_5] : memref<1xf32, #tpu.memory_space<smem>>
    %6 = vector.shape_cast %4 : vector<1x32xf32> to vector<1x1x32xf32>
    %7 = vector.broadcast %6 : vector<1x1x32xf32> to vector<8x2x32xf32>
    %8 = arith.mulf %3, %7 : vector<8x2x32xf32>
    %cst = arith.constant dense<0.000000e+00> : vector<8x2xf32>
    %9 = vector.multi_reduction <add>, %8, %cst [2] : vector<8x2x32xf32> to vector<8x2xf32>
    %10 = vector.broadcast %5 : f32 to vector<8x2xf32>
    %11 = arith.addf %9, %10 : vector<8x2xf32>
    %c0_6 = arith.constant 0 : index
    %c0_7 = arith.constant 0 : index
    %12 = vector.load %arg7[%c0_6, %c0_7] : memref<8x2xf32, #tpu.memory_space<vmem>>, vector<8x2xf32>
    tpu.vector_store %arg7[%c0_6, %c0_7], %11 {strides = array<i32>} : memref<8x2xf32, #tpu.memory_space<vmem>>, vector<8x2xf32>,
    %c0_8 = arith.constant 0 : index
    %c0_9 = arith.constant 0 : index
    %13 = vector.load %arg10[%c0_8, %c0_9] : memref<2x32xf32, #tpu.memory_space<vmem>>, vector<2x32xf32>
    %cst_10 = arith.constant dense<0xFF800000> : vector<2x32xf32>
    %14 = vector.multi_reduction <maximumf>, %3, %cst_10 [0] : vector<8x2x32xf32> to vector<2x32xf32>
    %15 = arith.maximumf %13, %14 : vector<2x32xf32>
    %c0_11 = arith.constant 0 : index
    %c0_12 = arith.constant 0 : index
    %16 = vector.load %arg10[%c0_11, %c0_12] : memref<2x32xf32, #tpu.memory_space<vmem>>, vector<2x32xf32>
    tpu.vector_store %arg10[%c0_11, %c0_12], %15 {strides = array<i32>} : memref<2x32xf32, #tpu.memory_space<vmem>>, vector<2x32xf32>,
    %c0_13 = arith.constant 0 : index
    %c0_14 = arith.constant 0 : index
    %17 = vector.load %arg11[%c0_13, %c0_14] : memref<8x128xf32, #tpu.memory_space<vmem>>, vector<1x2xf32>
    %cst_15 = arith.constant dense<0xFF800000> : vector<2xf32>
    %18 = vector.multi_reduction <maximumf>, %11, %cst_15 [0] : vector<8x2xf32> to vector<2xf32>
    %19 = vector.shape_cast %18 : vector<2xf32> to vector<1x2xf32>
    %20 = arith.maximumf %17, %19 : vector<1x2xf32>
    %c0_16 = arith.constant 0 : index
    %c0_17 = arith.constant 0 : index
    %21 = vector.load %arg11[%c0_16, %c0_17] : memref<8x128xf32, #tpu.memory_space<vmem>>, vector<1x2xf32>
    tpu.vector_store %arg11[%c0_16, %c0_17], %20 {strides = array<i32>} : memref<8x128xf32, #tpu.memory_space<vmem>>, vector<1x2xf32>,
    %c0_18 = arith.constant 0 : index
    %c0_19 = arith.constant 0 : index
    %22 = vector.load %arg12[%c0_18, %c0_19] : memref<8x128xf32, #tpu.memory_space<vmem>>, vector<1x2xf32>
    %cst_20 = arith.constant dense<0x7F800000> : vector<2xf32>
    %23 = vector.multi_reduction <minimumf>, %11, %cst_20 [0] : vector<8x2xf32> to vector<2xf32>
    %24 = vector.shape_cast %23 : vector<2xf32> to vector<1x2xf32>
    %25 = arith.minimumf %22, %24 : vector<1x2xf32>
    %c0_21 = arith.constant 0 : index
    %c0_22 = arith.constant 0 : index
    %26 = vector.load %arg12[%c0_21, %c0_22] : memref<8x128xf32, #tpu.memory_space<vmem>>, vector<1x2xf32>
    tpu.vector_store %arg12[%c0_21, %c0_22], %25 {strides = array<i32>} : memref<8x128xf32, #tpu.memory_space<vmem>>, vector<1x2xf32>,
    %c0_i32_23 = arith.constant 0 : i32
    %27 = arith.cmpi eq, %arg1, %c0_i32_23 : i32
    %28 = arith.extui %27 : i1 to i32
    %c0_i32_24 = arith.constant 0 : i32
    %29 = arith.cmpi ne, %28, %c0_i32_24 : i32
    scf.if %29 {
      %c0_25 = arith.constant 0 : index
      %c0_26 = arith.constant 0 : index
      %30 = vector.load %arg10[%c0_25, %c0_26] : memref<2x32xf32, #tpu.memory_space<vmem>>, vector<2x32xf32>
      %c0_27 = arith.constant 0 : index
      %c0_28 = arith.constant 0 : index
      %31 = vector.load %arg5[%c0_27, %c0_28] : memref<32x29xf32, #tpu.memory_space<vmem>>, vector<32x29xf32>
      %cst_29 = arith.constant dense<0.000000e+00> : vector<2x29xf32>
      %32 = tpu.matmul %30, %31, %cst_29 {dimension_numbers = #tpu.dot_dimension_numbers<[1], [0], [0], [1], [0, 0, 1, 1], [], []>} : vector<2x32xf32>, vector<32x29xf32>, vector<2x29xf32> -> vector<2x29xf32>
      %c0_30 = arith.constant 0 : index
      %c0_31 = arith.constant 0 : index
      %33 = vector.load %arg6[%c0_30, %c0_31] : memref<1x29xf32, #tpu.memory_space<vmem>>, vector<1x29xf32>
      %34 = vector.broadcast %33 : vector<1x29xf32> to vector<2x29xf32>
      %35 = arith.addf %32, %34 : vector<2x29xf32>
      %c0_32 = arith.constant 0 : index
      %c0_33 = arith.constant 0 : index
      %36 = vector.load %arg11[%c0_32, %c0_33] : memref<8x128xf32, #tpu.memory_space<vmem>>, vector<8x128xf32>
      %37 = tpu.transpose %36, [1, 0] : vector<8x128xf32> -> vector<128x8xf32>
      %38 = vector.extract_strided_slice %37 {offsets = [0, 0], sizes = [2, 1], strides = [1, 1]} : vector<128x8xf32> to vector<2x1xf32>
      %c0_34 = arith.constant 0 : index
      %c0_35 = arith.constant 0 : index
      %39 = vector.load %arg12[%c0_34, %c0_35] : memref<8x128xf32, #tpu.memory_space<vmem>>, vector<8x128xf32>
      %40 = tpu.transpose %39, [1, 0] : vector<8x128xf32> -> vector<128x8xf32>
      %41 = vector.extract_strided_slice %40 {offsets = [0, 0], sizes = [2, 1], strides = [1, 1]} : vector<128x8xf32> to vector<2x1xf32>
      %42 = arith.negf %38 : vector<2x1xf32>
      %43 = math.exp %42 : vector<2x1xf32>
      %cst_36 = arith.constant 1.000000e+00 : f32
      %44 = vector.broadcast %cst_36 : f32 to vector<2x1xf32>
      %45 = arith.addf %44, %43 : vector<2x1xf32>
      %46 = arith.divf %44, %45 : vector<2x1xf32>
      %47 = arith.negf %41 : vector<2x1xf32>
      %48 = math.exp %47 : vector<2x1xf32>
      %cst_37 = arith.constant 1.000000e+00 : f32
      %49 = vector.broadcast %cst_37 : f32 to vector<2x1xf32>
      %50 = arith.addf %49, %48 : vector<2x1xf32>
      %51 = arith.divf %49, %50 : vector<2x1xf32>
      %cst_38 = arith.constant 0.000000e+00 : f32
      %52 = vector.broadcast %cst_38 : f32 to vector<2x29xf32>
      %53 = arith.cmpf oge, %35, %52 : vector<2x29xf32>
      %54 = vector.broadcast %46 : vector<2x1xf32> to vector<2x29xf32>
      %55 = arith.mulf %54, %35 : vector<2x29xf32>
      %56 = vector.broadcast %51 : vector<2x1xf32> to vector<2x29xf32>
      %57 = arith.mulf %56, %35 : vector<2x29xf32>
      %58 = arith.select %53, %55, %57 : vector<2x29xi1>, vector<2x29xf32>
      %cst_39 = arith.constant dense<0xFF800000> : vector<2xf32>
      %59 = vector.multi_reduction <maximumf>, %58, %cst_39 [1] : vector<2x29xf32> to vector<2xf32>
      %60 = vector.shape_cast %59 : vector<2xf32> to vector<2x1xf32>
      %61 = vector.broadcast %60 : vector<2x1xf32> to vector<2x29xf32>
      %62 = arith.subf %58, %61 : vector<2x29xf32>
      %63 = math.exp %62 : vector<2x29xf32>
      %cst_40 = arith.constant dense<0.000000e+00> : vector<2xf32>
      %64 = vector.multi_reduction <add>, %63, %cst_40 [1] : vector<2x29xf32> to vector<2xf32>
      %65 = vector.shape_cast %64 : vector<2xf32> to vector<2x1xf32>
      %66 = vector.broadcast %65 : vector<2x1xf32> to vector<2x29xf32>
      %67 = arith.divf %63, %66 : vector<2x29xf32>
      %c0_41 = arith.constant 0 : index
      %c0_42 = arith.constant 0 : index
      %68 = vector.load %arg8[%c0_41, %c0_42] : memref<2x29xf32, #tpu.memory_space<vmem>>, vector<2x29xf32>
      tpu.vector_store %arg8[%c0_41, %c0_42], %35 {strides = array<i32>} : memref<2x29xf32, #tpu.memory_space<vmem>>, vector<2x29xf32>,
      %c0_43 = arith.constant 0 : index
      %c0_44 = arith.constant 0 : index
      %69 = vector.load %arg9[%c0_43, %c0_44] : memref<2x29xf32, #tpu.memory_space<vmem>>, vector<2x29xf32>
      tpu.vector_store %arg9[%c0_43, %c0_44], %67 {strides = array<i32>} : memref<2x29xf32, #tpu.memory_space<vmem>>, vector<2x29xf32>,
    } else {
    }
    return
  }
  func.func @transform_0(%arg0: i32, %arg1: i32) -> (i32, i32, i32) {
    %c0_i32 = arith.constant 0 : i32
    %c0_i32_0 = arith.constant 0 : i32
    return %arg1, %arg0, %c0_i32 : i32, i32, i32
  }
  func.func @transform_1(%arg0: i32, %arg1: i32) -> (i32, i32) {
    %c0_i32 = arith.constant 0 : i32
    %c0_i32_0 = arith.constant 0 : i32
    %c0_i32_1 = arith.constant 0 : i32
    return %c0_i32, %c0_i32_0 : i32, i32
  }
  func.func @transform_2(%arg0: i32, %arg1: i32) -> i32 {
    %c0_i32 = arith.constant 0 : i32
    %c0_i32_0 = arith.constant 0 : i32
    return %c0_i32 : i32
  }
  func.func @transform_3(%arg0: i32, %arg1: i32) -> (i32, i32) {
    %c0_i32 = arith.constant 0 : i32
    %c0_i32_0 = arith.constant 0 : i32
    %c0_i32_1 = arith.constant 0 : i32
    return %c0_i32, %c0_i32_0 : i32, i32
  }
  func.func @transform_4(%arg0: i32, %arg1: i32) -> (i32, i32) {
    %c0_i32 = arith.constant 0 : i32
    %c0_i32_0 = arith.constant 0 : i32
    %c0_i32_1 = arith.constant 0 : i32
    return %c0_i32, %c0_i32_0 : i32, i32
  }
  func.func @transform_5(%arg0: i32, %arg1: i32) -> (i32, i32) {
    %c0_i32 = arith.constant 0 : i32
    return %arg1, %arg0 : i32, i32
  }
  func.func @transform_6(%arg0: i32, %arg1: i32) -> (i32, i32) {
    %c0_i32 = arith.constant 0 : i32
    %c0_i32_0 = arith.constant 0 : i32
    return %arg0, %c0_i32 : i32, i32
  }
  func.func @transform_7(%arg0: i32, %arg1: i32) -> (i32, i32) {
    %c0_i32 = arith.constant 0 : i32
    %c0_i32_0 = arith.constant 0 : i32
    return %arg0, %c0_i32 : i32, i32
  }
}

</mosaic_0001>

<bundles_post_ra>
// kernel: tpu_custom_call.1
= control target key start
LH: loop header
LB: loop body
LE: loop exit
PB: predicated region body
PF: predicated region fallthrough
CT: control target
= control target key end

     0   :  { %14 = vsyncpa [#allocation7], 0  ;;  %s745_s0 = inlined_call_operand.hbm [shape: f32[8,2,32], index: 0, kind: input, shape index: {}]   ;;  %s746_s1 = inlined_call_operand.vmem [shape: f32[1,32], index: 1, kind: input, shape index: {}]   ;;  %s747_s2 = inlined_call_operand.<no memory space> [shape: f32[1], index: 2, kind: input, shape index: {}]   ;;  %s748_s3 = inlined_call_operand.hbm [shape: f32[32,29], index: 3, kind: input, shape index: {}]   ;;  %s749_s4 = inlined_call_operand.vmem [shape: f32[1,29], index: 4, kind: input, shape index: {}]   ;;  %s750_s5 = inlined_call_operand.vmem [shape: f32[8,2], index: 5, kind: output, shape index: {0}]   ;;  %s751_s6 = inlined_call_operand.hbm [shape: f32[2,29], index: 6, kind: output, shape index: {1}]   ;;  %s752_s7 = inlined_call_operand.hbm [shape: f32[2,29], index: 7, kind: output, shape index: {2}]  }
   0x1   :  { %15 = vsyncpa [#allocation10], 0 }
   0x2   :  { %16 = vsyncpa [#allocation8], 0 }
   0x3   :  { %17 = vsyncpa [#allocation13], 0  ;;  %s612_s24 = smov [#allocation6]  }
   0x4   :  { %s23_s25 = sshll.u32 %s612_s24, 4  ;;  %s24_s25 = int_to_ptr.vmem [resolvable:$true] %s23_s25 }
   0x5   :  { %s532_s26 = scalar_lea.vmem %s24_s25, 256  ;;  %p537_p1 = scmp.lt.s32.totalorder %s24_s25, %s24_s25 }
   0x6   :  { %p533_p0 = scmp.ne.s32.totalorder %s24_s25, %s532_s26  ;;  %p538_p2 = scmp.lt.s32.totalorder %s532_s26, %s532_s26 }
   0x8   :  { %p539_p3 = por %p538_p2, %p537_p1 }
   0xa   :  { %p540_p4 = pnand %p539_p3, %p533_p0 }
   0xc   :  { %543 = shalt.err (!%p540_p4)
}
   0xd   :  { %s613_s27 = smov 32   ;;  %s614_s28 = smov 2  }
   0xe   :  { %29 = dma.hbm_to_vmem [thread:$0]  %s745_s0, 256, %s24_s25, [#allocation7], %s613_s27, %s613_s27, %s614_s28  }
   0xf   :  { %s615_s8 = smov [#allocation9]  }
  0x10   :  { %s39_s9 = sshll.u32 %s615_s8, 4  ;;  %s40_s9 = int_to_ptr.vmem [resolvable:$true] %s39_s9 }
  0x11   :  { %s552_s10 = scalar_lea.vmem %s40_s9, 512  ;;  %p557_p6 = scmp.lt.s32.totalorder %s40_s9, %s40_s9 }
  0x12   :  { %p553_p5 = scmp.ne.s32.totalorder %s40_s9, %s552_s10  ;;  %p558_p7 = scmp.lt.s32.totalorder %s552_s10, %s552_s10 }
  0x14   :  { %p559_p8 = por %p558_p7, %p557_p6 }
  0x16   :  { %p560_p9 = pnand %p559_p8, %p553_p5 }
  0x18   :  { %563 = shalt.err (!%p560_p9)
}
  0x19   :  { %s616_s11 = smov 128   ;;  %s617_s12 = smov 8  }
  0x1a   :  { %45 = dma.hbm_to_vmem [thread:$0]  %s748_s3, 512, %s40_s9, [#allocation10], %s616_s11, %s616_s11, %s617_s12  }
  0x1b   :  { %604 = dma.done.wait [#allocation7], 256  }
  0x1c   :  { %605 = vsyncadd [#allocation7], 4294967040 }
  0x1d   :  { %606 = dma.done.wait [#allocation10], 512  }
  0x1e   :  { %607 = vsyncadd [#allocation10], 4294966784  ;;  %vm58_vm0 = vcmask 254976   ;;  %v618_v0 = vmov -inf   ;;  %v64_v1 = vld [vmem:[#allocation6 + $0x4] sm:$0x3]  ;;  %v128_v50 = vlaneseq  ;;  %v111_v53 = vstv %s747_s2 }
  0x1f   :  { %59 = vst.msk [vmem:[#allocation2] sm:$0x3] %vm58_vm0, %v618_v0  ;;  %60 = vst [vmem:[#allocation3] sm:$0xff] %v618_v0  ;;  %v476_v2 = vld [vmem:[%s746_s1] ss:$0 sm:$0xff]  ;;  %v182_v18 = vsel %vm58_vm0, %v64_v1, -inf }
  0x20   :  { %v62_v3 = vld [vmem:[#allocation6] sm:$0x3]  ;;  %v80_v4 = vmul.f32 %v476_v2, %v64_v1  ;;  %v65_v6 = vld [vmem:[#allocation6 + $0x6] sm:$0x3]  ;;  %v63_v7 = vld [vmem:[#allocation6 + $0x2] sm:$0x3] }
  0x21   :  { %v78_v5 = vmul.f32 %v476_v2, %v62_v3  ;;  %v180_v8 = vsel %vm58_vm0, %v62_v3, -inf  ;;  %v81_v9 = vmul.f32 %v476_v2, %v65_v6  ;;  %v79_v10 = vmul.f32 %v476_v2, %v63_v7  ;;  %v67_v12 = vld [vmem:[#allocation6 + $0xa] sm:$0x3]  ;;  %v66_v13 = vld [vmem:[#allocation6 + $0x8] sm:$0x3]  ;;  %v253_v46 = vld [vmem:[#allocation9 + $0x10] sm:$0xff] }
  0x22   :  { %v181_v11 = vsel %vm58_vm0, %v63_v7, -inf  ;;  %v93_v14 = vsel %vm58_vm0, %v80_v4, 0.0  ;;  %v183_v16 = vsel %vm58_vm0, %v65_v6, -inf  ;;  %v186_v17 = vsel %vm58_vm0, %v67_v12, -inf  ;;  %v69_v22 = vld [vmem:[#allocation6 + $0xe] sm:$0x3] }
  0x23   :  { %v87_v15 = vsel %vm58_vm0, %v78_v5, 0.0  ;;  %94 = vadd.xlane.f32.xlu1 %v93_v14  ;;  %v96_v19 = vsel %vm58_vm0, %v81_v9, 0.0  ;;  %v83_v20 = vmul.f32 %v476_v2, %v67_v12  ;;  %v187_v21 = vmax.f32 %v181_v11, %v186_v17  ;;  %v68_v29 = vld [vmem:[#allocation6 + $0xc] sm:$0x3]  ;;  %v252_v47 = vld [vmem:[#allocation9 + $0x8] sm:$0xff]  ;;  %v251_v48 = vld [vmem:[#allocation9] sm:$0xff] }
  0x24   :  { %88 = vadd.xlane.f32.xlu0 %v87_v15  ;;  %v90_v23 = vsel %vm58_vm0, %v79_v10, 0.0  ;;  %v82_v24 = vmul.f32 %v476_v2, %v66_v13  ;;  %v184_v25 = vsel %vm58_vm0, %v66_v13, -inf  ;;  %v190_v26 = vsel %vm58_vm0, %v69_v22, -inf  ;;  %v254_v44 = vld [vmem:[#allocation9 + $0x18] sm:$0xff] }
  0x25   :  { %v185_v27 = vmax.f32 %v180_v8, %v184_v25  ;;  %v191_v28 = vmax.f32 %v183_v16, %v190_v26  ;;  %v188_v30 = vsel %vm58_vm0, %v68_v29, -inf  ;;  %v102_v33 = vsel %vm58_vm0, %v83_v20, 0.0 }
  0x26   :  { %v189_v32 = vmax.f32 %v182_v18, %v188_v30  ;;  %v99_v34 = vsel %vm58_vm0, %v82_v24, 0.0  ;;  %v85_v35 = vmul.f32 %v476_v2, %v69_v22  ;;  %v84_v36 = vmul.f32 %v476_v2, %v68_v29  ;;  %v179_v38 = vld [vmem:[#allocation2] sm:$0x3] }
  0x27   :  { %97 = vadd.xlane.f32.xlu1 %v96_v19  ;;  %v192_v31 = vmax.f32 %v185_v27, %v187_v21  ;;  %v619_v43 = vmov inf   ;;  %v620_v45 = vmov 0.0   ;;  %vm621_vm1 = vmmov 0  }
  0x28   :  { %91 = vadd.xlane.f32.xlu0 %v90_v23  ;;  %v193_v37 = vmax.f32 %v189_v32, %v191_v28  ;;  %v108_v40 = vsel %vm58_vm0, %v85_v35, 0.0  ;;  %v105_v41 = vsel %vm58_vm0, %v84_v36, 0.0  ;;  %61 = vst [vmem:[#allocation4] sm:$0xff] %v619_v43  ;;  %486 = vmatprep.subr.mxu0 %v620_v45  ;;  %vm262_vm2 = vcmask 261120  }
  0x29   :  { %494 = vmatprep.mubr.msk.f32.mxu0 %vm621_vm1, %v620_v45  ;;  %487 = vmatpush3.msra.mxu0 %v254_v44  ;;  %v129_v51 = vand.u32 127, %v128_v50  ;;  %v131_v52 = vshrl.u32 %v128_v50, 7  ;;  %vm198_vm3 = vcmask 1041408   ;;  %vm162_vm4 = vcmask 1041409  }
  0x2a   :  { %v194_v39 = vmax.f32 %v192_v31, %v193_v37  ;;  %488 = vmatprep.subr.mxu0 %v620_v45  ;;  %vm164_vm5 = vcmask 1042434   ;;  %vm166_vm6 = vcmask 1043459   ;;  %vm168_vm7 = vcmask 1044484  }
  0x2b   :  { %103 = vadd.xlane.f32.xlu1 %v102_v33  ;;  %489 = vmatpush3.msra.mxu0 %v253_v46  ;;  %v695_v56 = vsub.s32 %v129_v51, %v131_v52  ;;  %vm170_vm8 = vcmask 1045509   ;;  %vm172_vm9 = vcmask 1046534   ;;  %vm174_vm10 = vcmask 1047559   ;;  %v197_v52 = vld [vmem:[#allocation3] sm:$0x1] }
  0x2c   :  { %100 = vadd.xlane.f32.xlu0 %v99_v34  ;;  %v195_v42 = vmax.f32 %v179_v38, %v194_v39  ;;  %490 = vmatprep.subr.mxu0 %v620_v45  ;;  %vm177_vm11 = vcmask 15360   ;;  %vm221_vm12 = vcmask 8192   ;;  %vm428_vm13 = vcmask 230400  }
  0x2d   :  { %491 = vmatpush3.msra.mxu0 %v252_v47 }
  0x2e   :  { %196 = vst.msk [vmem:[#allocation2] sm:$0x3] %vm58_vm0, %v195_v42  ;;  %492 = vmatprep.subr.mxu0 %v620_v45 }
  0x2f   :  { %109 = vadd.xlane.f32.xlu1 %v108_v40  ;;  %493 = vmatpush3.msra.mxu0 %v251_v48 }
  0x30   :  { %106 = vadd.xlane.f32.xlu0 %v105_v41 }
  0x35   :  { %v250_v49 = vld [vmem:[#allocation2] sm:$0x3] }
  0x36   :  { %495 = vmatmul.mubr.msk.f32.vlgmr.msra.gmra.mxu0 %vm262_vm2, %v250_v49 }
  0xac   :  { %v95_v54 = vpop.xlane.xlu1 %94 }
  0xad   :  { %v89_v55 = vpop.xlane.xlu0 %88  ;;  %v114_v58 = vadd.f32 %v111_v53, %v95_v54 }
  0xae   :  { %v112_v57 = vadd.f32 %v111_v53, %v89_v55 }
  0xaf   :  { %v141_v1 = vrot.slane %v114_v58, %v695_v56  ;;  %v201_v7 = vsel %vm198_vm3, %v114_v58, -inf  ;;  %v226_v37 = vsel %vm198_vm3, %v114_v58, inf }
  0xb0   :  { %v98_v59 = vpop.xlane.xlu1 %97  ;;  %v133_v63 = vrot.slane %v112_v57, %v695_v56  ;;  %v199_v8 = vsel %vm198_vm3, %v112_v57, -inf  ;;  %v224_v11 = vsel %vm198_vm3, %v112_v57, inf }
  0xb1   :  { %v92_v60 = vpop.xlane.xlu0 %91  ;;  %v115_v62 = vadd.f32 %v111_v53, %v98_v59 }
  0xb2   :  { %v113_v61 = vadd.f32 %v111_v53, %v92_v60 }
  0xb3   :  { %v145_v9 = vrot.slane %v115_v62, %v695_v56  ;;  %v202_v12 = vsel %vm198_vm3, %v115_v62, -inf  ;;  %v227_v25 = vsel %vm198_vm3, %v115_v62, inf }
  0xb4   :  { %v137_v0 = vrot.slane %v113_v61, %v695_v56  ;;  %v104_v2 = vpop.xlane.xlu1 %103  ;;  %v200_v15 = vsel %vm198_vm3, %v113_v61, -inf  ;;  %v225_v21 = vsel %vm198_vm3, %v113_v61, inf  ;;  %v622_v61 = vmov 0  }
  0xb5   :  { %v101_v3 = vpop.xlane.xlu0 %100  ;;  %v117_v5 = vadd.f32 %v111_v53, %v104_v2 }
  0xb6   :  { %v163_v4 = vsel %vm162_vm4, %v137_v0, %v133_v63  ;;  %v116_v6 = vadd.f32 %v111_v53, %v101_v3 }
  0xb7   :  { %v165_v10 = vsel %vm164_vm5, %v141_v1, %v163_v4  ;;  %v205_v13 = vsel %vm198_vm3, %v117_v5, -inf  ;;  %v230_v14 = vsel %vm198_vm3, %v117_v5, inf  ;;  %v153_v26 = vrot.slane %v117_v5, %v695_v56 }
  0xb8   :  { %v167_v16 = vsel %vm166_vm6, %v145_v9, %v165_v10  ;;  %v149_v17 = vrot.slane %v116_v6, %v695_v56  ;;  %v203_v18 = vsel %vm198_vm3, %v116_v6, -inf  ;;  %v110_v19 = vpop.xlane.xlu1 %109  ;;  %v228_v22 = vsel %vm198_vm3, %v116_v6, inf }
  0xb9   :  { %v107_v20 = vpop.xlane.xlu0 %106  ;;  %v119_v23 = vadd.f32 %v111_v53, %v110_v19  ;;  %v206_v27 = vmax.f32 %v200_v15, %v205_v13  ;;  %v231_v28 = vmin.f32 %v225_v21, %v230_v14  ;;  %v204_v30 = vmax.f32 %v199_v8, %v203_v18 }
  0xba   :  { %v118_v24 = vadd.f32 %v111_v53, %v107_v20  ;;  %v169_v29 = vsel %vm168_vm7, %v149_v17, %v167_v16  ;;  %v229_v33 = vmin.f32 %v224_v11, %v228_v22  ;;  %v223_v53 = vld [vmem:[#allocation4] sm:$0x1] }
  0xbb   :  { %v209_v31 = vsel %vm198_vm3, %v119_v23, -inf  ;;  %v234_v32 = vsel %vm198_vm3, %v119_v23, inf  ;;  %v161_v34 = vrot.slane %v119_v23, %v695_v56  ;;  %v171_v41 = vsel %vm170_vm8, %v153_v26, %v169_v29 }
  0xbc   :  { %v210_v35 = vmax.f32 %v202_v12, %v209_v31  ;;  %v235_v36 = vmin.f32 %v227_v25, %v234_v32  ;;  %v157_v38 = vrot.slane %v118_v24, %v695_v56  ;;  %v207_v39 = vsel %vm198_vm3, %v118_v24, -inf }
  0xbd   :  { %v232_v40 = vsel %vm198_vm3, %v118_v24, inf  ;;  %v208_v42 = vmax.f32 %v201_v7, %v207_v39  ;;  %v211_v44 = vmax.f32 %v204_v30, %v206_v27  ;;  %v236_v46 = vmin.f32 %v229_v33, %v231_v28  ;;  %v477_v7 = vld [vmem:[%s749_s4] ss:$0 sm:$0xff]  ;;  %s623_s4 = smov [#allocation11]  }
  0xbe   :  { %v233_v43 = vmin.f32 %v226_v37, %v232_v40  ;;  %v173_v45 = vsel %vm172_vm9, %v157_v38, %v171_v41  ;;  %s450_s18 = sshll.u32 %s623_s4, 4  ;;  %s451_s18 = int_to_ptr.vmem [resolvable:$true] %s450_s18 }
  0xbf   :  { %v175_v47 = vsel %vm174_vm10, %v161_v34, %v173_v45  ;;  %v212_v48 = vmax.f32 %v208_v42, %v210_v35  ;;  %s564_s19 = scalar_lea.vmem %s451_s18, 32  ;;  %p569_p11 = scmp.lt.s32.totalorder %s451_s18, %s451_s18 }
  0xc0   :  { %v237_v49 = vmin.f32 %v233_v43, %v235_v36  ;;  %178 = vst.msk [vmem:[%s750_s5] sm:$0xff] %vm177_vm11, %v175_v47  ;;  %p565_p10 = scmp.ne.s32.totalorder %s451_s18, %s564_s19  ;;  %p570_p12 = scmp.lt.s32.totalorder %s564_s19, %s564_s19 }
  0xc1   :  { %v213_v50 = vmax.f32 %v211_v44, %v212_v48 }
  0xc2   :  { %v238_v51 = vmin.f32 %v236_v46, %v237_v49  ;;  %p571_p13 = por %p570_p12, %p569_p11 }
  0xc3   :  { %v218_v54 = vrot.slane %v213_v50, %v695_v56 }
  0xc4   :  { %v243_v55 = vrot.slane %v238_v51, %v695_v56  ;;  %p572_p0 = pnand %p571_p13, %p565_p10 }
  0xc5   :  { %v220_v57 = vmax.f32 %v197_v52, %v218_v54 }
  0xc6   :  { %v245_v58 = vmin.f32 %v223_v53, %v243_v55 }
  0xc7   :  { %222 = vst.msk [vmem:[#allocation3] sm:$0x1] %vm221_vm12, %v220_v57 }
  0xc8   :  { %246 = vst.msk [vmem:[#allocation4] sm:$0x1] %vm221_vm12, %v245_v58 }
  0xce   :  { %v336_v60 = vld [vmem:[#allocation3] sm:$0xff] }
  0xcf   :  { %v369_v59 = vld [vmem:[#allocation4] sm:$0xff]  ;;  %337 = vxpose.xlu0.b32.start.end [1/1] (short) (narrow) %v336_v60, 8 }
  0xd0   :  { %370 = vxpose.xlu1.b32.start.end [1/1] (short) (narrow) %v369_v59, 8 }
  0xee   :  { %511 = vset.pattern.permute.xlu1 %v622_v61 }
  0xf6   :  { %v332_v62 = vpop.f32.mrf.mxu0 }
  0xf7   :  { %v333_v8 = vadd.f32 %v477_v7, %v332_v62 }
  0xf8   :  { %510 = vset.pattern.permute.xlu0 %v622_v61  ;;  %v496_v63 = vpop.f32.mrf.mxu0 }
  0xf9   :  { %440 = vst.msk [vmem:[#allocation11] sm:$0x3] %vm428_vm13, %v333_v8  ;;  %vm414_vm14 = vcmp.ge.f32.partialorder %v333_v8, 0.0 }
 0x14b   :  { %v353_v1 = vpop.trf.xlu0 }
 0x14c   :  { %v386_v0 = vpop.trf.xlu1  ;;  %v479_v3 = vmul.f32 -1.442695, %v353_v1 }
 0x14d   :  { %v480_v2 = vmul.f32 -1.442695, %v386_v0 }
 0x14f   :  { %512 = vpow2.f32 %v480_v2 }
 0x150   :  { %514 = vpow2.f32 %v479_v3 }
 0x15c   :  { %v513_v56 = vpop.eup %512 }
 0x15d   :  { %v515_v4 = vpop.eup %514  ;;  %v411_v5 = vadd.f32 1.0, %v513_v56 }
 0x15e   :  { %v405_v6 = vadd.f32 1.0, %v515_v4 }
 0x15f   :  { %516 = vrcp.f32 %v411_v5 }
 0x160   :  { %518 = vrcp.f32 %v405_v6 }
 0x16c   :  { %v517_v9 = vpop.eup %516 }
 0x16d   :  { %v519_v10 = vpop.eup %518  ;;  %423 = vperm.xlu1 %511, %v517_v9  }
 0x16e   :  { %417 = vperm.xlu0 %510, %v519_v10  }
 0x1e8   :  { %v424_v11 = vpop.permute.xlu1 %423 }
 0x1e9   :  { %v426_v12 = vmul.f32 %v424_v11, %v333_v8  ;;  %v418_v13 = vpop.permute.xlu0 %417 }
 0x1ea   :  { %v420_v14 = vmul.f32 %v418_v13, %v333_v8 }
 0x1ec   :  { %v427_v15 = vsel %vm414_vm14, %v420_v14, %v426_v12 }
 0x1ed   :  { %v429_v16 = vsel %vm428_vm13, %v427_v15, -inf }
 0x1ee   :  { %430 = vmax.xlane.f32.xlu1 %v429_v16 }
 0x277   :  { %v431_v17 = vpop.xlane.xlu1 %430 }
 0x278   :  { %v432_v18 = vsub.f32 %v427_v15, %v431_v17 }
 0x27a   :  { %v433_v19 = vmul.f32 1.442695, %v432_v18 }
 0x27c   :  { %520 = vpow2.f32 %v433_v19 }
 0x289   :  { %v521_v20 = vpop.eup %520 }
 0x28a   :  { %v435_v21 = vsel %vm428_vm13, %v521_v20, 0.0 }
 0x28b   :  { %436 = vadd.xlane.f32.xlu0 %v435_v21 }
 0x28c   :  { %575 = shalt.err (!%p572_p0)
}
 0x28d   :  { %453 = dma.vmem_to_hbm [thread:$0]  %s451_s18, 32, %s751_s6, [#allocation8]  }
 0x28e   :  { %s624_s22 = smov [#allocation12]  }
 0x28f   :  { %s460_s23 = sshll.u32 %s624_s22, 4  ;;  %s461_s23 = int_to_ptr.vmem [resolvable:$true] %s460_s23 }
 0x290   :  { %s584_s24 = scalar_lea.vmem %s461_s23, 32  ;;  %p589_p2 = scmp.lt.s32.totalorder %s461_s23, %s461_s23 }
 0x291   :  { %p585_p1 = scmp.ne.s32.totalorder %s461_s23, %s584_s24  ;;  %p590_p3 = scmp.lt.s32.totalorder %s584_s24, %s584_s24 }
 0x293   :  { %p591_p4 = por %p590_p3, %p589_p2 }
 0x295   :  { %p592_p5 = pnand %p591_p4, %p585_p1 }
 0x314   :  { %v437_v22 = vpop.xlane.xlu0 %436 }
 0x315   :  { %522 = vrcp.f32 %v437_v22 }
 0x322   :  { %v523_v23 = vpop.eup %522 }
 0x323   :  { %v439_v24 = vmul.f32 %v523_v23, %v521_v20 }
 0x325   :  { %441 = vst.msk [vmem:[#allocation12] sm:$0x3] %vm428_vm13, %v439_v24 }
 0x326   :  { %595 = shalt.err (!%p592_p5)
}
 0x327   :  { %463 = dma.vmem_to_hbm [thread:$0]  %s461_s23, 32, %s752_s7, [#allocation13]  }
 0x328   :  { %608 = dma.done.wait [#allocation8], 32  }
 0x329   :  { %609 = vsyncadd [#allocation8], 4294967264 }
 0x32a   :  { %610 = dma.done.wait [#allocation13], 32  }
 0x32b   :  { %611 = vsyncadd [#allocation13], 4294967264 }
 0x32c   :  { %472 = vsyncpa [#allocation7], 1 }
 0x32d   :  { %473 = vsyncpa [#allocation10], 1 }
 0x32e   :  { %474 = vsyncpa [#allocation8], 1 }
 0x32f   :  { %475 = vsyncpa [#allocation13], 1 }

</bundles_post_ra>
